<compile_context>
chip_gen: v7x
topology: tpu7x:2x2x1
jax: 0.10.0
libtpu: 0.0.40
codegen_flags: <defaults>
</compile_context>

<pallas_src>
import jax
import jax.numpy as jnp
from jax.experimental import pallas as pl
from jax.experimental.pallas import tpu as pltpu


def _round_up(n, m):
    return ((n + m - 1) // m) * m


def _mlp_full_kernel(x_ref, w1_ref, b1_ref, w2_ref, b2_ref, w3_ref, b3_ref, out_ref):
    # x tile: [TM, Fp] bf16; weights: bf16 [in, out]; biases: f32 [1, out].
    # MXU matmuls accumulate in f32; bias adds stay f32.
    x = x_ref[...]
    h1 = jnp.dot(x, w1_ref[...], preferred_element_type=jnp.float32) + b1_ref[...]
    h2 = jnp.dot(h1.astype(jnp.bfloat16), w2_ref[...],
                 preferred_element_type=jnp.float32) + b2_ref[...]
    y = jnp.dot(h2.astype(jnp.bfloat16), w3_ref[...],
                preferred_element_type=jnp.float32) + b3_ref[...]
    out_ref[...] = y  # lane-dense f32 store ([TM, Cp], Cp % 128 == 0)


def _mlp_latent_kernel(x_ref, w1_ref, b1_ref, w2_ref, b2_ref, out_ref):
    # fc1 -> fc2 only (module's latent=True path).
    x = x_ref[...]
    h1 = jnp.dot(x, w1_ref[...], preferred_element_type=jnp.float32) + b1_ref[...]
    h2 = jnp.dot(h1.astype(jnp.bfloat16), w2_ref[...],
                 preferred_element_type=jnp.float32) + b2_ref[...]
    out_ref[...] = h2  # lane-dense f32 store ([TM, Hp], Hp % 128 == 0)


def mlp_forward(x, padded_params, *, num_classes, num_hidden=100, latent=False,
                tm_max=512):
    """x: [B, F] float32.  padded_params: output of prepare_params()."""
    p = padded_params
    w1, b1, w2, b2, w3, b3 = (p[k] for k in ("w1", "b1", "w2", "b2", "w3", "b3"))
    B, F = x.shape
    Fp, Hp = w1.shape
    Cp = w3.shape[1]

    # Batch tile: multiple of 8 (sublanes).  Larger tiles amortize the ~0.35us
    # per-grid-step overhead; cap so double-buffered tiles + f32 intermediates
    # stay comfortably inside VMEM even on v7x (64 MiB).
    tm = min(tm_max, _round_up(B, 8))
    Bp = _round_up(B, tm)

    # Pad batch & feature dims and cast to bf16 once, outside the hot loop.
    x_p = jnp.zeros((Bp, Fp), jnp.bfloat16).at[:B, :F].set(x.astype(jnp.bfloat16))

    w_spec = lambda shape: pl.BlockSpec(shape, lambda i: (0, 0))  # VMEM-resident
    x_spec = pl.BlockSpec((tm, Fp), lambda i: (i, 0))             # tiled over batch

    if latent:
        kernel = _mlp_latent_kernel
        operands = (x_p, w1, b1, w2, b2)
        in_specs = [x_spec, w_spec((Fp, Hp)), w_spec((1, Hp)),
                    w_spec((Hp, Hp)), w_spec((1, Hp))]
        out_cols, valid_cols = Hp, num_hidden
        flops = 2 * Bp * (Fp * Hp + Hp * Hp)
        bytes_accessed = (x_p.size * 2 + (w1.size + w2.size) * 2
                          + (b1.size + b2.size) * 4 + Bp * Hp * 4)
    else:
        kernel = _mlp_full_kernel
        operands = (x_p, w1, b1, w2, b2, w3, b3)
        in_specs = [x_spec, w_spec((Fp, Hp)), w_spec((1, Hp)),
                    w_spec((Hp, Hp)), w_spec((1, Hp)),
                    w_spec((Hp, Cp)), w_spec((1, Cp))]
        out_cols, valid_cols = Cp, num_classes
        flops = 2 * Bp * (Fp * Hp + Hp * Hp + Hp * Cp)
        bytes_accessed = (x_p.size * 2 + (w1.size + w2.size + w3.size) * 2
                          + (b1.size + b2.size + b3.size) * 4 + Bp * Cp * 4)

    out_p = pl.pallas_call(
        kernel,
        out_shape=jax.ShapeDtypeStruct((Bp, out_cols), jnp.float32),
        grid=(Bp // tm,),
        in_specs=in_specs,
        out_specs=pl.BlockSpec((tm, out_cols), lambda i: (i, 0)),
        compiler_params=pltpu.CompilerParams(
            dimension_semantics=("parallel",),          # megacore on v7x
            vmem_limit_bytes=48 * 1024 * 1024,          # fits v7x's 64 MiB VMEM
        ),
        cost_estimate=pl.CostEstimate(
            flops=flops, transcendentals=0, bytes_accessed=bytes_accessed
        ),
    )(*operands)

    return out_p[:B, :valid_cols]


def init_params(key, num_input_features, num_classes, num_hidden=100):
    """Deterministic init mimicking torch.nn.Linear (uniform +/- 1/sqrt(fan_in)).

    Returns unpadded f32 params with weights in [in, out] layout, biases [1, out].
    """
    def linear(k, fan_in, fan_out):
        kw, kb = jax.random.split(k)
        bound = 1.0 / jnp.sqrt(fan_in)
        w = jax.random.uniform(kw, (fan_in, fan_out), jnp.float32, -bound, bound)
        b = jax.random.uniform(kb, (1, fan_out), jnp.float32, -bound, bound)
        return w, b

    k1, k2, k3 = jax.random.split(key, 3)
    w1, b1 = linear(k1, num_input_features, num_hidden)
    w2, b2 = linear(k2, num_hidden, num_hidden)
    w3, b3 = linear(k3, num_hidden, num_classes)
    return {"w1": w1, "b1": b1, "w2": w2, "b2": b2, "w3": w3, "b3": b3}


def prepare_params(params):
    """Zero-pad all dims to multiples of 128 (lane-dense) and pre-cast weights
    to bf16; biases stay f32 for the f32 bias adds."""
    def pad2(a, rows, cols, dtype):
        out = jnp.zeros((rows, cols), dtype)
        return out.at[: a.shape[0], : a.shape[1]].set(a.astype(dtype))

    F, H = params["w1"].shape
    C = params["w3"].shape[1]
    Fp, Hp, Cp = _round_up(F, 128), _round_up(H, 128), _round_up(C, 128)
    return {
        "w1": pad2(params["w1"], Fp, Hp, jnp.bfloat16),
        "b1": pad2(params["b1"], 1, Hp, jnp.float32),
        "w2": pad2(params["w2"], Hp, Hp, jnp.bfloat16),
        "b2": pad2(params["b2"], 1, Hp, jnp.float32),
        "w3": pad2(params["w3"], Hp, Cp, jnp.bfloat16),
        "b3": pad2(params["b3"], 1, Cp, jnp.float32),
    }


def mlp_reference(x, p, latent=False):
    h1 = x @ p["w1"] + p["b1"]
    h2 = h1 @ p["w2"] + p["b2"]
    if latent:
        return h2
    return h2 @ p["w3"] + p["b3"]


if __name__ == "__main__":
    key = jax.random.PRNGKey(0)
    kx, kp = jax.random.split(key)

    batch = 8
    num_input_features = 32
    num_classes = 10
    num_hidden = 100  # module default; exercises the 100 -> 128 padding path

    x = jax.random.normal(kx, (batch, num_input_features), jnp.float32)
    params = init_params(kp, num_input_features, num_classes, num_hidden)
    padded = prepare_params(params)

    # Full forward (latent=False).
    y = mlp_forward(x, padded, num_classes=num_classes, num_hidden=num_hidden)
    jax.block_until_ready(y)
    y_ref = mlp_reference(x, params)
    assert y.shape == (batch, num_classes)
    # bf16 matmul operands with f32 accumulation -> loosened tolerance vs f32 ref.
    assert jnp.allclose(y, y_ref, atol=5e-2, rtol=5e-2), float(
        jnp.max(jnp.abs(y - y_ref))
    )

    # Latent path (return fc2 output), per the PyTorch module.
    z = mlp_forward(x, padded, num_classes=num_classes, num_hidden=num_hidden,
                    latent=True)
    jax.block_until_ready(z)
    z_ref = mlp_reference(x, params, latent=True)
    assert z.shape == (batch, num_hidden)
    assert jnp.allclose(z, z_ref, atol=5e-2, rtol=5e-2), float(
        jnp.max(jnp.abs(z - z_ref))
    )

    print("KERNEL_OK")
</pallas_src>

<mosaic_0001>
module attributes {stable_mosaic.version = 11 : i64} {
  func.func @_mlp_full_kernel(%arg0: i32, %arg1: memref<8x128xbf16, #tpu.memory_space<vmem>>, %arg2: memref<128x128xbf16, #tpu.memory_space<vmem>>, %arg3: memref<1x128xf32, #tpu.memory_space<vmem>>, %arg4: memref<128x128xbf16, #tpu.memory_space<vmem>>, %arg5: memref<1x128xf32, #tpu.memory_space<vmem>>, %arg6: memref<128x128xbf16, #tpu.memory_space<vmem>>, %arg7: memref<1x128xf32, #tpu.memory_space<vmem>>, %arg8: memref<8x128xf32, #tpu.memory_space<vmem>>) attributes {dimension_semantics = [#tpu.dimension_semantics<parallel>], iteration_bounds = array<i64: 1>, scalar_prefetch = 0 : i64, scratch_operands = 0 : i64, tpu.core_type = #tpu.core_type<tc>, window_params = [{transform_indices = @transform_0, window_bounds = array<i64: 8, 128>}, {pipeline_mode = #tpu.pipeline_mode<synchronous>, transform_indices = @transform_1, window_bounds = array<i64: 128, 128>}, {pipeline_mode = #tpu.pipeline_mode<synchronous>, transform_indices = @transform_2, window_bounds = array<i64: 1, 128>}, {pipeline_mode = #tpu.pipeline_mode<synchronous>, transform_indices = @transform_3, window_bounds = array<i64: 128, 128>}, {pipeline_mode = #tpu.pipeline_mode<synchronous>, transform_indices = @transform_4, window_bounds = array<i64: 1, 128>}, {pipeline_mode = #tpu.pipeline_mode<synchronous>, transform_indices = @transform_5, window_bounds = array<i64: 128, 128>}, {pipeline_mode = #tpu.pipeline_mode<synchronous>, transform_indices = @transform_6, window_bounds = array<i64: 1, 128>}, {transform_indices = @transform_7, window_bounds = array<i64: 8, 128>}]} {
    %c0 = arith.constant 0 : index
    %c0_0 = arith.constant 0 : index
    %0 = vector.load %arg1[%c0, %c0_0] : memref<8x128xbf16, #tpu.memory_space<vmem>>, vector<8x128xbf16>
    %c0_1 = arith.constant 0 : index
    %c0_2 = arith.constant 0 : index
    %1 = vector.load %arg2[%c0_1, %c0_2] : memref<128x128xbf16, #tpu.memory_space<vmem>>, vector<128x128xbf16>
    %cst = arith.constant dense<0.000000e+00> : vector<8x128xf32>
    %2 = tpu.matmul %0, %1, %cst {dimension_numbers = #tpu.dot_dimension_numbers<[1], [0], [0], [1], [0, 0, 1, 1], [], []>} : vector<8x128xbf16>, vector<128x128xbf16>, vector<8x128xf32> -> vector<8x128xf32>
    %c0_3 = arith.constant 0 : index
    %c0_4 = arith.constant 0 : index
    %3 = vector.load %arg3[%c0_3, %c0_4] : memref<1x128xf32, #tpu.memory_space<vmem>>, vector<1x128xf32>
    %4 = vector.broadcast %3 : vector<1x128xf32> to vector<8x128xf32>
    %5 = arith.addf %2, %4 : vector<8x128xf32>
    %6 = arith.truncf %5 : vector<8x128xf32> to vector<8x128xbf16>
    %c0_5 = arith.constant 0 : index
    %c0_6 = arith.constant 0 : index
    %7 = vector.load %arg4[%c0_5, %c0_6] : memref<128x128xbf16, #tpu.memory_space<vmem>>, vector<128x128xbf16>
    %cst_7 = arith.constant dense<0.000000e+00> : vector<8x128xf32>
    %8 = tpu.matmul %6, %7, %cst_7 {dimension_numbers = #tpu.dot_dimension_numbers<[1], [0], [0], [1], [0, 0, 1, 1], [], []>} : vector<8x128xbf16>, vector<128x128xbf16>, vector<8x128xf32> -> vector<8x128xf32>
    %c0_8 = arith.constant 0 : index
    %c0_9 = arith.constant 0 : index
    %9 = vector.load %arg5[%c0_8, %c0_9] : memref<1x128xf32, #tpu.memory_space<vmem>>, vector<1x128xf32>
    %10 = vector.broadcast %9 : vector<1x128xf32> to vector<8x128xf32>
    %11 = arith.addf %8, %10 : vector<8x128xf32>
    %12 = arith.truncf %11 : vector<8x128xf32> to vector<8x128xbf16>
    %c0_10 = arith.constant 0 : index
    %c0_11 = arith.constant 0 : index
    %13 = vector.load %arg6[%c0_10, %c0_11] : memref<128x128xbf16, #tpu.memory_space<vmem>>, vector<128x128xbf16>
    %cst_12 = arith.constant dense<0.000000e+00> : vector<8x128xf32>
    %14 = tpu.matmul %12, %13, %cst_12 {dimension_numbers = #tpu.dot_dimension_numbers<[1], [0], [0], [1], [0, 0, 1, 1], [], []>} : vector<8x128xbf16>, vector<128x128xbf16>, vector<8x128xf32> -> vector<8x128xf32>
    %c0_13 = arith.constant 0 : index
    %c0_14 = arith.constant 0 : index
    %15 = vector.load %arg7[%c0_13, %c0_14] : memref<1x128xf32, #tpu.memory_space<vmem>>, vector<1x128xf32>
    %16 = vector.broadcast %15 : vector<1x128xf32> to vector<8x128xf32>
    %17 = arith.addf %14, %16 : vector<8x128xf32>
    %c0_15 = arith.constant 0 : index
    %c0_16 = arith.constant 0 : index
    %18 = vector.load %arg8[%c0_15, %c0_16] : memref<8x128xf32, #tpu.memory_space<vmem>>, vector<8x128xf32>
    tpu.vector_store %arg8[%c0_15, %c0_16], %17 {strides = array<i32>} : memref<8x128xf32, #tpu.memory_space<vmem>>, vector<8x128xf32>,
    return
  }
  func.func @transform_0(%arg0: i32) -> (i32, i32) {
    %c0_i32 = arith.constant 0 : i32
    %c0_i32_0 = arith.constant 0 : i32
    return %arg0, %c0_i32 : i32, i32
  }
  func.func @transform_1(%arg0: i32) -> (i32, i32) {
    %c0_i32 = arith.constant 0 : i32
    %c0_i32_0 = arith.constant 0 : i32
    %c0_i32_1 = arith.constant 0 : i32
    return %c0_i32, %c0_i32_0 : i32, i32
  }
  func.func @transform_2(%arg0: i32) -> (i32, i32) {
    %c0_i32 = arith.constant 0 : i32
    %c0_i32_0 = arith.constant 0 : i32
    %c0_i32_1 = arith.constant 0 : i32
    return %c0_i32, %c0_i32_0 : i32, i32
  }
  func.func @transform_3(%arg0: i32) -> (i32, i32) {
    %c0_i32 = arith.constant 0 : i32
    %c0_i32_0 = arith.constant 0 : i32
    %c0_i32_1 = arith.constant 0 : i32
    return %c0_i32, %c0_i32_0 : i32, i32
  }
  func.func @transform_4(%arg0: i32) -> (i32, i32) {
    %c0_i32 = arith.constant 0 : i32
    %c0_i32_0 = arith.constant 0 : i32
    %c0_i32_1 = arith.constant 0 : i32
    return %c0_i32, %c0_i32_0 : i32, i32
  }
  func.func @transform_5(%arg0: i32) -> (i32, i32) {
    %c0_i32 = arith.constant 0 : i32
    %c0_i32_0 = arith.constant 0 : i32
    %c0_i32_1 = arith.constant 0 : i32
    return %c0_i32, %c0_i32_0 : i32, i32
  }
  func.func @transform_6(%arg0: i32) -> (i32, i32) {
    %c0_i32 = arith.constant 0 : i32
    %c0_i32_0 = arith.constant 0 : i32
    %c0_i32_1 = arith.constant 0 : i32
    return %c0_i32, %c0_i32_0 : i32, i32
  }
  func.func @transform_7(%arg0: i32) -> (i32, i32) {
    %c0_i32 = arith.constant 0 : i32
    %c0_i32_0 = arith.constant 0 : i32
    return %arg0, %c0_i32 : i32, i32
  }
}

</mosaic_0001>

<bundles_post_ra>
// kernel: tpu_custom_call.1
= control target key start
LH: loop header
LB: loop body
LE: loop exit
PB: predicated region body
PF: predicated region fallthrough
CT: control target
= control target key end

     0   :  { %12 = vsyncpa [#allocation3], 0  ;;  %s857_s0 = inlined_call_operand.hbm [shape: bf16[8,128], index: 0, kind: input, shape index: {}]   ;;  %s858_s1 = inlined_call_operand.hbm [shape: bf16[128,128], index: 1, kind: input, shape index: {}]   ;;  %s859_s2 = inlined_call_operand.vmem [shape: f32[1,128], index: 2, kind: input, shape index: {}]   ;;  %s860_s3 = inlined_call_operand.hbm [shape: bf16[128,128], index: 3, kind: input, shape index: {}]   ;;  %s861_s4 = inlined_call_operand.vmem [shape: f32[1,128], index: 4, kind: input, shape index: {}]   ;;  %s862_s5 = inlined_call_operand.hbm [shape: bf16[128,128], index: 5, kind: input, shape index: {}]   ;;  %s863_s6 = inlined_call_operand.vmem [shape: f32[1,128], index: 6, kind: input, shape index: {}]   ;;  %s864_s7 = inlined_call_operand.hbm [shape: f32[8,128], index: 7, kind: output, shape index: {}]  }
   0x1   :  { %13 = vsyncpa [#allocation6], 0 }
   0x2   :  { %14 = vsyncpa [#allocation9], 0 }
   0x3   :  { %15 = vsyncpa [#allocation4], 0  ;;  %s700_s24 = smov [#allocation5]   ;;  %s582_s28 = scalar_lea.hbm %s858_s1, 1024 }
   0x4   :  { %s31_s25 = sshll.u32 %s700_s24, 4  ;;  %p583_p0 = scmp.ne.s32.totalorder %s858_s1, %s582_s28  ;;  %s32_s25 = int_to_ptr.vmem [resolvable:$true] %s31_s25 }
   0x5   :  { %p586_p1 = scmp.lt.u32.totalorder %s582_s28, %s858_s1 }
   0x7   :  { %p588_p2 = pnand %p586_p1, %p583_p0 }
   0x9   :  { %591 = shalt.err (!%p588_p2)
}
   0xa   :  { %s592_s10 = scalar_lea.vmem %s32_s25, 1024  ;;  %p597_p4 = scmp.lt.s32.totalorder %s32_s25, %s32_s25 }
   0xb   :  { %p593_p3 = scmp.ne.s32.totalorder %s32_s25, %s592_s10  ;;  %p598_p5 = scmp.lt.s32.totalorder %s592_s10, %s592_s10 }
   0xd   :  { %p599_p6 = por %p598_p5, %p597_p4 }
   0xf   :  { %p600_p7 = pnand %p599_p6, %p593_p3 }
  0x11   :  { %603 = shalt.err (!%p600_p7)
}
  0x12   :  { %s701_s11 = smov 64   ;;  %s702_s12 = smov 4  }
  0x13   :  { %37 = dma.hbm_to_vmem [thread:$0]  %s858_s1, 1024, %s32_s25, [#allocation6], %s701_s11, %s701_s11, %s702_s12  }
  0x14   :  { %s703_s15 = smov [#allocation2]   ;;  %s704_s17 = smov [#allocation7]  }
  0x15   :  { %s22_s16 = sshll.u32 %s703_s15, 4  ;;  %s45_s18 = sshll.u32 %s704_s17, 4  ;;  %s23_s16 = int_to_ptr.vmem [resolvable:$true] %s22_s16  ;;  %s46_s18 = int_to_ptr.vmem [resolvable:$true] %s45_s18 }
  0x16   :  { %s604_s21 = scalar_lea.hbm %s857_s0, 64 }
  0x17   :  { %p605_p8 = scmp.ne.s32.totalorder %s857_s0, %s604_s21  ;;  %p608_p9 = scmp.lt.u32.totalorder %s604_s21, %s857_s0 }
  0x19   :  { %p610_p10 = pnand %p608_p9, %p605_p8 }
  0x1b   :  { %613 = shalt.err (!%p610_p10)
}
  0x1c   :  { %s614_s1 = scalar_lea.vmem %s23_s16, 64  ;;  %p619_p12 = scmp.lt.s32.totalorder %s23_s16, %s23_s16 }
  0x1d   :  { %p615_p11 = scmp.ne.s32.totalorder %s23_s16, %s614_s1  ;;  %p620_p13 = scmp.lt.s32.totalorder %s614_s1, %s614_s1 }
  0x1f   :  { %p621_p0 = por %p620_p13, %p619_p12 }
  0x21   :  { %p622_p1 = pnand %p621_p0, %p615_p11 }
  0x23   :  { %625 = shalt.err (!%p622_p1)
}
  0x24   :  { %25 = dma.hbm_to_vmem [thread:$0]  %s857_s0, 64, %s23_s16, [#allocation3]  }
  0x25   :  { %s626_s30 = scalar_lea.hbm %s860_s3, 1024 }
  0x26   :  { %p627_p2 = scmp.ne.s32.totalorder %s860_s3, %s626_s30  ;;  %p630_p3 = scmp.lt.u32.totalorder %s626_s30, %s860_s3 }
  0x28   :  { %p632_p4 = pnand %p630_p3, %p627_p2 }
  0x2a   :  { %635 = shalt.err (!%p632_p4)
}
  0x2b   :  { %s636_s14 = scalar_lea.vmem %s46_s18, 1024  ;;  %p641_p6 = scmp.lt.s32.totalorder %s46_s18, %s46_s18 }
  0x2c   :  { %p637_p5 = scmp.ne.s32.totalorder %s46_s18, %s636_s14  ;;  %p642_p7 = scmp.lt.s32.totalorder %s636_s14, %s636_s14 }
  0x2e   :  { %p643_p8 = por %p642_p7, %p641_p6 }
  0x30   :  { %p644_p9 = pnand %p643_p8, %p637_p5 }
  0x32   :  { %647 = shalt.err (!%p644_p9)
}
  0x33   :  { %51 = dma.hbm_to_vmem [thread:$0]  %s860_s3, 1024, %s46_s18, [#allocation6], %s701_s11, %s701_s11, %s702_s12  }
  0x34   :  { %s705_s16 = smov [#allocation8]   ;;  %s648_s21 = scalar_lea.hbm %s862_s5, 1024 }
  0x35   :  { %s59_s17 = sshll.u32 %s705_s16, 4  ;;  %p649_p10 = scmp.ne.s32.totalorder %s862_s5, %s648_s21  ;;  %s60_s17 = int_to_ptr.vmem [resolvable:$true] %s59_s17 }
  0x36   :  { %p652_p11 = scmp.lt.u32.totalorder %s648_s21, %s862_s5 }
  0x38   :  { %p654_p12 = pnand %p652_p11, %p649_p10 }
  0x3a   :  { %657 = shalt.err (!%p654_p12)
}
  0x3b   :  { %s658_s1 = scalar_lea.vmem %s60_s17, 1024  ;;  %p663_p0 = scmp.lt.s32.totalorder %s60_s17, %s60_s17 }
  0x3c   :  { %p659_p13 = scmp.ne.s32.totalorder %s60_s17, %s658_s1  ;;  %p664_p1 = scmp.lt.s32.totalorder %s658_s1, %s658_s1 }
  0x3e   :  { %p665_p2 = por %p664_p1, %p663_p0 }
  0x40   :  { %p666_p3 = pnand %p665_p2, %p659_p13 }
  0x42   :  { %669 = shalt.err (!%p666_p3)
}
  0x43   :  { %65 = dma.hbm_to_vmem [thread:$0]  %s862_s5, 1024, %s60_s17, [#allocation9], %s701_s11, %s701_s11, %s702_s12  }
  0x44   :  { %692 = dma.done.wait [#allocation3], 64  }
  0x45   :  { %693 = vsyncadd [#allocation3], 4294967232 }
  0x46   :  { %694 = dma.done.wait [#allocation6], 2048  }
  0x47   :  { %695 = vsyncadd [#allocation6], 4294965248 }
  0x48   :  { %696 = dma.done.wait [#allocation9], 1024  }
  0x49   :  { %697 = vsyncadd [#allocation9], 4294966272  ;;  %v706_v0 = vmov 0.0   ;;  %vm707_vm0 = vmmov 0   ;;  %v558_v1 = vld [vmem:[#allocation5] sm:$0xff]   ;;  %v559_v2 = vld [vmem:[#allocation5 + $0x8] sm:$0xff]  }
  0x4a   :  { %489 = vmatprep.subr.bf16.mxu0 %v706_v0  ;;  %505 = vmatprep.mubr.msk.bf16.mxu0 %vm707_vm0, %v706_v0  ;;  %v560_v3 = vld [vmem:[#allocation5 + $0x10] sm:$0xff]   ;;  %v566_v4 = vld [vmem:[#allocation7] sm:$0xff]   ;;  %v561_v5 = vld [vmem:[#allocation5 + $0x18] sm:$0xff]   ;;  %s708_s28 = smov [#allocation10]  }
  0x4b   :  { %509 = vmatprep.subr.bf16.mxu1 %v706_v0  ;;  %525 = vmatprep.mubr.msk.bf16.mxu1 %vm707_vm0, %v706_v0  ;;  %v567_v6 = vld [vmem:[#allocation7 + $0x8] sm:$0xff]   ;;  %v562_v7 = vld [vmem:[#allocation5 + $0x20] sm:$0xff]   ;;  %v568_v8 = vld [vmem:[#allocation7 + $0x10] sm:$0xff]   ;;  %s424_s29 = sshll.u32 %s708_s28, 4  ;;  %s425_s29 = int_to_ptr.vmem [resolvable:$true] %s424_s29 }
  0x4c   :  { %490 = vmatpush3.bf16.msra.mxu0 %v558_v1  ;;  %510 = vmatpush3.bf16.msra.mxu1 %v566_v4  ;;  %v563_v9 = vld [vmem:[#allocation5 + $0x28] sm:$0xff]   ;;  %v569_v10 = vld [vmem:[#allocation7 + $0x18] sm:$0xff]   ;;  %v564_v11 = vld [vmem:[#allocation5 + $0x30] sm:$0xff]   ;;  %p675_p5 = scmp.lt.s32.totalorder %s425_s29, %s425_s29 }
  0x4d   :  { %491 = vmatprep.subr.bf16.mxu0 %v706_v0  ;;  %511 = vmatprep.subr.bf16.mxu1 %v706_v0  ;;  %v570_v12 = vld [vmem:[#allocation7 + $0x20] sm:$0xff]   ;;  %v565_v13 = vld [vmem:[#allocation5 + $0x38] sm:$0xff]   ;;  %v571_v14 = vld [vmem:[#allocation7 + $0x28] sm:$0xff]  }
  0x4e   :  { %v81_v15 = vld [vmem:[#allocation2] sm:$0xf]  ;;  %v572_v16 = vld [vmem:[#allocation7 + $0x30] sm:$0xff]   ;;  %v574_v18 = vld [vmem:[#allocation8] sm:$0xff]  }
  0x4f   :  { %v573_v17 = vld [vmem:[#allocation7 + $0x38] sm:$0xff]   ;;  %v575_v19 = vld [vmem:[#allocation8 + $0x8] sm:$0xff]   ;;  %v576_v20 = vld [vmem:[#allocation8 + $0x10] sm:$0xff]  }
  0x50   :  { %492 = vmatpush3.bf16.msra.mxu0 %v559_v2  ;;  %512 = vmatpush3.bf16.msra.mxu1 %v567_v6  ;;  %v577_v21 = vld [vmem:[#allocation8 + $0x18] sm:$0xff]   ;;  %v578_v22 = vld [vmem:[#allocation8 + $0x20] sm:$0xff]   ;;  %v579_v23 = vld [vmem:[#allocation8 + $0x28] sm:$0xff]  }
  0x51   :  { %493 = vmatprep.subr.bf16.mxu0 %v706_v0  ;;  %513 = vmatprep.subr.bf16.mxu1 %v706_v0  ;;  %v580_v24 = vld [vmem:[#allocation8 + $0x30] sm:$0xff]   ;;  %v435_v25 = vld [vmem:[%s859_s2] ss:$0 sm:$0xff] }
  0x52   :  { %v581_v32 = vld [vmem:[#allocation8 + $0x38] sm:$0xff]  }
  0x53   :  { %v444_v33 = vld [vmem:[%s861_s4] ss:$0 sm:$0xff]  ;;  %s670_s4 = scalar_lea.vmem %s425_s29, 128 }
  0x54   :  { %494 = vmatpush3.bf16.msra.mxu0 %v560_v3  ;;  %514 = vmatpush3.bf16.msra.mxu1 %v568_v8  ;;  %v453_v40 = vld [vmem:[%s863_s6] ss:$0 sm:$0xff]  ;;  %p671_p4 = scmp.ne.s32.totalorder %s425_s29, %s670_s4  ;;  %p676_p6 = scmp.lt.s32.totalorder %s670_s4, %s670_s4 }
  0x55   :  { %495 = vmatprep.subr.bf16.mxu0 %v706_v0  ;;  %515 = vmatprep.subr.bf16.mxu1 %v706_v0 }
  0x56   :  { %p677_p7 = por %p676_p6, %p675_p5 }
  0x58   :  { %496 = vmatpush3.bf16.msra.mxu0 %v561_v5  ;;  %516 = vmatpush3.bf16.msra.mxu1 %v569_v10  ;;  %p678_p8 = pnand %p677_p7, %p671_p4 }
  0x59   :  { %497 = vmatprep.subr.bf16.mxu0 %v706_v0  ;;  %517 = vmatprep.subr.bf16.mxu1 %v706_v0 }
  0x5c   :  { %498 = vmatpush3.bf16.msra.mxu0 %v562_v7  ;;  %518 = vmatpush3.bf16.msra.mxu1 %v570_v12 }
  0x5d   :  { %499 = vmatprep.subr.bf16.mxu0 %v706_v0  ;;  %519 = vmatprep.subr.bf16.mxu1 %v706_v0 }
  0x60   :  { %500 = vmatpush3.bf16.msra.mxu0 %v563_v9  ;;  %520 = vmatpush3.bf16.msra.mxu1 %v571_v14 }
  0x61   :  { %501 = vmatprep.subr.bf16.mxu0 %v706_v0  ;;  %521 = vmatprep.subr.bf16.mxu1 %v706_v0 }
  0x64   :  { %502 = vmatpush3.bf16.msra.mxu0 %v564_v11  ;;  %522 = vmatpush3.bf16.msra.mxu1 %v572_v16 }
  0x65   :  { %503 = vmatprep.subr.bf16.mxu0 %v706_v0  ;;  %523 = vmatprep.subr.bf16.mxu1 %v706_v0 }
  0x68   :  { %504 = vmatpush3.bf16.msra.mxu0 %v565_v13  ;;  %524 = vmatpush3.bf16.msra.mxu1 %v573_v17 }
  0x69   :  { %529 = vmatprep.subr.bf16.mxu0 %v706_v0 }
  0x6b   :  { %506 = vmatmul.mubr.bf16.vlgmr.msra.gmra.mrb[0].mxu0 %v81_v15 }
  0x6c   :  { %545 = vmatprep.mubr.msk.bf16.mxu0 %vm707_vm0, %v706_v0  ;;  %530 = vmatpush3.bf16.msra.mxu0 %v574_v18 }
  0x6d   :  { %531 = vmatprep.subr.bf16.mxu0 %v706_v0 }
  0x70   :  { %532 = vmatpush3.bf16.msra.mxu0 %v575_v19 }
  0x71   :  { %533 = vmatprep.subr.bf16.mxu0 %v706_v0 }
  0x74   :  { %534 = vmatpush3.bf16.msra.mxu0 %v576_v20 }
  0x75   :  { %535 = vmatprep.subr.bf16.mxu0 %v706_v0 }
  0x78   :  { %536 = vmatpush3.bf16.msra.mxu0 %v577_v21 }
  0x79   :  { %537 = vmatprep.subr.bf16.mxu0 %v706_v0 }
  0x7c   :  { %538 = vmatpush3.bf16.msra.mxu0 %v578_v22 }
  0x7d   :  { %539 = vmatprep.subr.bf16.mxu0 %v706_v0 }
  0x80   :  { %540 = vmatpush3.bf16.msra.mxu0 %v579_v23 }
  0x81   :  { %541 = vmatprep.subr.bf16.mxu0 %v706_v0 }
  0x84   :  { %542 = vmatpush3.bf16.msra.mxu0 %v580_v24 }
  0x85   :  { %543 = vmatprep.subr.bf16.mxu0 %v706_v0 }
  0x88   :  { %544 = vmatpush3.bf16.msra.mxu0 %v581_v32 }
 0x13e   :  { %v187_v26 = vpop.f32.mrb[0].mxu0 }
 0x13f   :  { %v188_v27 = vadd.f32 %v435_v25, %v187_v26  ;;  %v507_v28 = vpop.f32.mrb[1].mxu0 }
 0x140   :  { %v190_v29 = vpop.f32.mrb[2].mxu0 }
 0x141   :  { %v193_v30 = vpack.c.bf16 %v188_v27, %v188_v27  ;;  %v508_v31 = vpop.f32.mrb[3].mxu0 }
 0x143   :  { %526 = vmatmul.mubr.bf16.vlgmr.msra.gmra.mrb[0].mxu1 %v193_v30 }
 0x216   :  { %v299_v34 = vpop.f32.mrb[0].mxu1 }
 0x217   :  { %v300_v35 = vadd.f32 %v444_v33, %v299_v34  ;;  %v527_v36 = vpop.f32.mrb[1].mxu1 }
 0x218   :  { %v302_v37 = vpop.f32.mrb[2].mxu1 }
 0x219   :  { %v305_v38 = vpack.c.bf16 %v300_v35, %v300_v35  ;;  %v528_v39 = vpop.f32.mrb[3].mxu1 }
 0x21b   :  { %546 = vmatmul.mubr.bf16.vlgmr.msra.gmra.mrb[4].mxu0 %v305_v38 }
 0x2ee   :  { %v411_v41 = vpop.f32.mrb[4].mxu0 }
 0x2ef   :  { %v412_v42 = vadd.f32 %v453_v40, %v411_v41  ;;  %v547_v43 = vpop.f32.mrb[5].mxu0 }
 0x2f0   :  { %v414_v44 = vpop.f32.mrb[6].mxu0 }
 0x2f1   :  { %417 = vst [vmem:[#allocation10] sm:$0xff] %v412_v42  ;;  %v548_v45 = vpop.f32.mrb[7].mxu0 }
 0x2f2   :  { %681 = shalt.err (!%p678_p8)
}
 0x2f3   :  { %s682_s6 = scalar_lea.hbm %s864_s7, 128 }
 0x2f4   :  { %p683_p9 = scmp.ne.s32.totalorder %s864_s7, %s682_s6  ;;  %p686_p10 = scmp.lt.u32.totalorder %s682_s6, %s864_s7 }
 0x2f6   :  { %p688_p11 = pnand %p686_p10, %p683_p9 }
 0x2f8   :  { %691 = shalt.err (!%p688_p11)
}
 0x2f9   :  { %427 = dma.vmem_to_hbm [thread:$0]  %s425_s29, 128, %s864_s7, [#allocation4]  }
 0x2fa   :  { %698 = dma.done.wait [#allocation4], 128  }
 0x2fb   :  { %699 = vsyncadd [#allocation4], 4294967168 }
 0x2fc   :  { %431 = vsyncpa [#allocation3], 1 }
 0x2fd   :  { %432 = vsyncpa [#allocation6], 1 }
 0x2fe   :  { %433 = vsyncpa [#allocation9], 1 }
 0x2ff   :  { %434 = vsyncpa [#allocation4], 1 }

</bundles_post_ra>
